<compile_context>
chip_gen: v7x
topology: tpu7x:2x2x1
jax: 0.10.0
libtpu: 0.0.40
codegen_flags: <defaults>
</compile_context>

<pallas_src>
import functools

import jax
import jax.numpy as jnp
from jax.experimental import pallas as pl
from jax.experimental.pallas import tpu as pltpu


def _round_up(n, m):
    return ((n + m - 1) // m) * m


def _pick_tile(n_pad):
    for t in (512, 256, 128):
        if n_pad % t == 0:
            return t
    return 128


def _vmem_limit_bytes():
    # Generation-aware scoped-VMEM limit (v5e/v6e: 128 MiB phys, v7x: 64 MiB).
    try:
        cap = int(getattr(pltpu.get_tpu_info(), "vmem_capacity_bytes",
                          64 * 1024 * 1024))
    except Exception:
        cap = 64 * 1024 * 1024
    return max(32 * 1024 * 1024, min(cap - 16 * 1024 * 1024, 100 * 1024 * 1024))


# ----------------------------------------------------------------------------
# Kernel 1: projection + per-node attention scores (tiled over node rows)
# ----------------------------------------------------------------------------
def _project_kernel(x_ref, w_ref, shift_ref, a_ref, xp1_ref, s_ref, *, hc):
    xp = jnp.dot(x_ref[...], w_ref[...],
                 preferred_element_type=jnp.float32)           # [TM, hc] f32
    xp = xp + shift_ref[...]                                    # folded BatchNorm
    # fused src/dst scores for all heads in one matmul -> [TM, 2H]
    s_ref[...] = jnp.dot(xp, a_ref[...], preferred_element_type=jnp.float32)
    # store [xp | 1] in bf16; the ones column makes the softmax denominator a
    # free extra MXU output column in the attention kernel.
    xp1_ref[:, :hc] = xp.astype(jnp.bfloat16)
    xp1_ref[:, hc:hc + 1] = jnp.ones((xp.shape[0], 1), jnp.bfloat16)


# ----------------------------------------------------------------------------
# Kernel 2: masked softmax + aggregation, tiled over (dst rows, src rows)
# ----------------------------------------------------------------------------
def _gat_attn_kernel(adj_ref, dstm_ref, ssrc_ref, xp1_ref, bias_ref, o_ref,
                     acc_ref, *, heads, out_ch, hc, concat, outer_leaky):
    j = pl.program_id(1)

    @pl.when(j == 0)
    def _():
        acc_ref[...] = jnp.zeros_like(acc_ref)

    adjf = adj_ref[...].astype(jnp.float32)        # [TM, TN] in {0, 1}
    dstm = dstm_ref[...]                           # [TM, 2H]: [s_dst | m_ub]
    s_src = ssrc_ref[...]                          # [H, TN]
    xp1 = xp1_ref[...]                             # [TN, hc+1] bf16

    for h in range(heads):                         # heads is small & static
        logits = dstm[:, h:h + 1] + s_src[h:h + 1, :]              # [TM, TN]
        e = jnp.where(logits > 0, logits, 0.2 * logits)            # leaky(0.2)
        e = e - dstm[:, heads + h:heads + h + 1]                   # - upper bound
        # e <= 0 everywhere (m_ub is a global per-row max bound), so exp <= 1.
        p = jnp.where(adjf > 0, jnp.exp(e), 0.0)
        acc_ref[h] = acc_ref[h] + jnp.dot(
            p.astype(jnp.bfloat16), xp1, preferred_element_type=jnp.float32)

    @pl.when(j == pl.num_programs(1) - 1)
    def _():
        bias = bias_ref[...]                       # [1, out_dim]
        vals = []
        for h in range(heads):
            a = acc_ref[h]                         # [TM, hc+1]
            # self-loops guarantee denom > 0 unless the per-head score spread
            # exceeds ~85 (f32 exp underflow); guard keeps the result finite.
            # TODO(synk): fall back to an exact in-kernel row max if score
            # spreads that large are ever expected.
            denom = jnp.maximum(a[:, hc:hc + 1], 1e-30)
            # approx reciprocal: ~1e-3 rel. error vs exact softmax (inference OK).
            vals.append(a[:, h * out_ch:(h + 1) * out_ch]
                        * pl.reciprocal(denom, approx=True))
        if concat:
            out = jnp.concatenate(vals, axis=1) + bias
        else:
            acc_mean = vals[0]
            for v in vals[1:]:
                acc_mean = acc_mean + v
            out = acc_mean / jnp.float32(heads) + bias
        if outer_leaky:                            # F.leaky_relu (slope 0.01)
            out = jnp.where(out > 0, out, 0.01 * out)
        o_ref[...] = out.astype(o_ref.dtype)       # single lane-dense store


# ----------------------------------------------------------------------------
# Per-layer wrapper
# ----------------------------------------------------------------------------
def _fused_score_matrix(att_src, att_dst):
    # [H, C] x2 -> [H*C, 2H] block-diagonal so xp @ A = [s_src | s_dst].
    h, c = att_src.shape
    eye = jnp.eye(h, dtype=jnp.float32)
    a_src = (att_src.astype(jnp.float32)[:, :, None] * eye[:, None, :]).reshape(h * c, h)
    a_dst = (att_dst.astype(jnp.float32)[:, :, None] * eye[:, None, :]).reshape(h * c, h)
    return jnp.concatenate([a_src, a_dst], axis=1)


def gat_conv_layer(x_bf16, adj, w, att_src, att_dst, bias, shift, *,
                   heads, out_ch, concat, outer_leaky, tile_m, tile_n,
                   out_dtype, vmem_limit):
    n_pad, fin = x_bf16.shape
    hc = heads * out_ch
    hc1 = hc + 1
    out_dim = hc if concat else out_ch

    a_all = _fused_score_matrix(att_src, att_dst)          # [hc, 2H]

    proj_params = pltpu.CompilerParams(dimension_semantics=("parallel",),
                                       vmem_limit_bytes=vmem_limit)
    xp1, s_all = pl.pallas_call(
        functools.partial(_project_kernel, hc=hc),
        out_shape=(jax.ShapeDtypeStruct((n_pad, hc1), jnp.bfloat16),
                   jax.ShapeDtypeStruct((n_pad, 2 * heads), jnp.float32)),
        grid=(n_pad // tile_m,),
        in_specs=[pl.BlockSpec((tile_m, fin), lambda i: (i, 0)),
                  pl.BlockSpec((fin, hc), lambda i: (0, 0)),
                  pl.BlockSpec((1, hc), lambda i: (0, 0)),
                  pl.BlockSpec((hc, 2 * heads), lambda i: (0, 0))],
        out_specs=(pl.BlockSpec((tile_m, hc1), lambda i: (i, 0)),
                   pl.BlockSpec((tile_m, 2 * heads), lambda i: (i, 0))),
        compiler_params=proj_params,
    )(x_bf16, w.astype(jnp.bfloat16),
      shift.reshape(1, hc).astype(jnp.float32), a_all)

    # Tiny O(N*H) glue in plain JAX: split scores, per-head src-max upper bound
    # (softmax is shift-invariant, so using the bound is exact up to fp).
    s_src = s_all[:, :heads]                       # [N, H]
    s_dst = s_all[:, heads:]                       # [N, H]
    smax = jnp.max(s_src, axis=0)                  # [H]
    lb = s_dst + smax[None, :]
    m_ub = jnp.where(lb > 0, lb, 0.2 * lb)         # leaky(0.2) of the bound
    dstm = jnp.concatenate([s_dst, m_ub], axis=1)  # [N, 2H]
    s_src_t = s_src.T                              # [H, N]

    attn_params = pltpu.CompilerParams(
        dimension_semantics=("parallel", "arbitrary"),
        vmem_limit_bytes=vmem_limit)
    kern = functools.partial(_gat_attn_kernel, heads=heads, out_ch=out_ch,
                             hc=hc, concat=concat, outer_leaky=outer_leaky)
    out = pl.pallas_call(
        kern,
        out_shape=jax.ShapeDtypeStruct((n_pad, out_dim), out_dtype),
        grid=(n_pad // tile_m, n_pad // tile_n),
        in_specs=[pl.BlockSpec((tile_m, tile_n), lambda i, j: (i, j)),   # adj int8
                  pl.BlockSpec((tile_m, 2 * heads), lambda i, j: (i, 0)),  # s_dst|m_ub
                  pl.BlockSpec((heads, tile_n), lambda i, j: (0, j)),    # s_src^T
                  pl.BlockSpec((tile_n, hc1), lambda i, j: (j, 0)),      # [xp | 1]
                  pl.BlockSpec((1, out_dim), lambda i, j: (0, 0))],      # bias
        out_specs=pl.BlockSpec((tile_m, out_dim), lambda i, j: (i, 0)),
        scratch_shapes=[pltpu.VMEM((heads, tile_m, hc1), jnp.float32)],
        compiler_params=attn_params,
    )(adj, dstm, s_src_t, xp1, bias.reshape(1, out_dim).astype(jnp.float32))
    return out


# ----------------------------------------------------------------------------
# Full GAT forward
# ----------------------------------------------------------------------------
def build_adj_int8(edge_index, n_pad):
    # adj[dst, src] = 1 for every edge plus self loops (GATConv default), else 0.
    # Self-loops are added on padded rows too so the softmax denom is never zero.
    # TODO(synk): duplicate edges in edge_index each count in PyG's softmax; the
    # dense adjacency collapses duplicates (inputs here have none).
    src, dst = edge_index[0], edge_index[1]
    adj = jnp.zeros((n_pad, n_pad), jnp.int8)
    adj = adj.at[dst, src].set(1)
    diag = jnp.arange(n_pad)
    adj = adj.at[diag, diag].set(1)
    return adj


def gat_forward(params, x, edge_index):
    n, fin = x.shape
    n_pad = _round_up(max(n, 128), 128)
    tile = _pick_tile(n_pad)
    vmem_limit = _vmem_limit_bytes()

    adj = build_adj_int8(edge_index, n_pad)

    # Fold eval-mode BatchNorm1d into the first projection (exact):
    #   y = x*scale + (beta - mean*scale);  y@W = x@(diag(scale)W) + shift
    scale = params["bn_gamma"] * jax.lax.rsqrt(params["bn_var"] + 1e-5)
    bn_shift = params["bn_beta"] - params["bn_mean"] * scale

    x_pad = jnp.zeros((n_pad, fin), jnp.float32).at[:n].set(x)
    x_cur = x_pad.astype(jnp.bfloat16)

    bn_done = False
    for lyr in params["hidden_layers"]:
        w = lyr["W"]
        if not bn_done:
            shift = bn_shift @ w               # shift uses the UNSCALED W
            w_eff = scale[:, None] * w
            bn_done = True
        else:
            w_eff = w
            shift = jnp.zeros((w.shape[1],), jnp.float32)
        x_cur = gat_conv_layer(x_cur, adj, w_eff, lyr["att_src"], lyr["att_dst"],
                               lyr["bias"], shift, heads=lyr["heads"],
                               out_ch=lyr["out_ch"], concat=True,
                               outer_leaky=True, tile_m=tile, tile_n=tile,
                               out_dtype=jnp.bfloat16, vmem_limit=vmem_limit)
        # TODO(synk): F.dropout / GATConv attention dropout are identity in eval mode.

    # Final GATConv: heads=1, concat=False, no activation.
    # Pad output width 2 -> 127 so the ones-augmented xp1 slab is exactly 128 lanes.
    last = params["last_layer"]
    oc, oc_pad = last["out_ch"], 127
    in_dim = last["W"].shape[0]
    w_pad = jnp.zeros((in_dim, oc_pad), jnp.float32).at[:, :oc].set(last["W"])
    asrc_pad = jnp.zeros((1, oc_pad), jnp.float32).at[:, :oc].set(last["att_src"])
    adst_pad = jnp.zeros((1, oc_pad), jnp.float32).at[:, :oc].set(last["att_dst"])
    bias_pad = jnp.zeros((oc_pad,), jnp.float32).at[:oc].set(last["bias"])
    if not bn_done:
        shift = bn_shift @ w_pad               # unscaled W first (bug fix)
        w_pad = scale[:, None] * w_pad
    else:
        shift = jnp.zeros((oc_pad,), jnp.float32)
    out = gat_conv_layer(x_cur, adj, w_pad, asrc_pad, adst_pad, bias_pad, shift,
                         heads=1, out_ch=oc_pad, concat=False, outer_leaky=False,
                         tile_m=tile, tile_n=tile, out_dtype=jnp.float32,
                         vmem_limit=vmem_limit)
    out = out[:n, :oc]

    # temperature scaling (scalar glue in plain JAX)
    temp = jnp.clip(params["temperature"], 0.1, 2.0)
    return out / (temp + 1e-8)


# ----------------------------------------------------------------------------
# Deterministic parameter construction (shapes follow GAT.__init__)
# ----------------------------------------------------------------------------
def init_params(key, num_features, hidden_channels, heads, num_layers):
    def glorot(k, shape):
        fan_in, fan_out = shape[0], shape[-1]
        lim = jnp.sqrt(6.0 / (fan_in + fan_out))
        return jax.random.uniform(k, shape, jnp.float32, -lim, lim)

    n_hidden = num_layers - 1
    keys = jax.random.split(key, 3 * n_hidden + 3)
    ki = iter(range(len(keys)))

    params = {
        "bn_gamma": jnp.ones((num_features,), jnp.float32),
        "bn_beta": jnp.zeros((num_features,), jnp.float32),
        "bn_mean": jnp.zeros((num_features,), jnp.float32),
        "bn_var": jnp.ones((num_features,), jnp.float32),
        "temperature": jnp.float32(0.5),
        "hidden_layers": [],
    }
    in_dim = num_features
    for _ in range(n_hidden):
        params["hidden_layers"].append({
            "W": glorot(keys[next(ki)], (in_dim, heads * hidden_channels)),
            "att_src": glorot(keys[next(ki)], (heads, hidden_channels)),
            "att_dst": glorot(keys[next(ki)], (heads, hidden_channels)),
            "bias": jnp.zeros((heads * hidden_channels,), jnp.float32),
            "heads": heads,
            "out_ch": hidden_channels,
        })
        in_dim = heads * hidden_channels

    params["last_layer"] = {
        "W": glorot(keys[next(ki)], (in_dim, 2)),
        "att_src": glorot(keys[next(ki)], (1, 2)),
        "att_dst": glorot(keys[next(ki)], (1, 2)),
        "bias": jnp.zeros((2,), jnp.float32),
        "heads": 1,
        "out_ch": 2,
    }
    return params


if __name__ == "__main__":
    key = jax.random.PRNGKey(0)
    k_x, k_e, k_p = jax.random.split(key, 3)

    # small synthetic graph
    num_nodes = 64
    num_features = 16
    hidden_channels = 16
    heads = 4
    num_layers = 3
    num_edges = 256

    x = jax.random.normal(k_x, (num_nodes, num_features), jnp.float32)
    edge_index = jax.random.randint(k_e, (2, num_edges), 0, num_nodes,
                                    dtype=jnp.int32)

    params = init_params(k_p, num_features, hidden_channels, heads, num_layers)

    out = gat_forward(params, x, edge_index)
    out = jax.block_until_ready(out)

    assert out.shape == (num_nodes, 2), out.shape
    assert bool(jnp.all(jnp.isfinite(out)))
    print("KERNEL_OK")
</pallas_src>

<mosaic_0001>
module attributes {stable_mosaic.version = 11 : i64} {
  func.func @_project_kernel(%arg0: i32, %arg1: memref<128x16xbf16, #tpu.memory_space<vmem>>, %arg2: memref<16x64xbf16, #tpu.memory_space<vmem>>, %arg3: memref<1x64xf32, #tpu.memory_space<vmem>>, %arg4: memref<64x8xf32, #tpu.memory_space<vmem>>, %arg5: memref<128x65xbf16, #tpu.memory_space<vmem>>, %arg6: memref<128x8xf32, #tpu.memory_space<vmem>>) attributes {dimension_semantics = [#tpu.dimension_semantics<parallel>], iteration_bounds = array<i64: 1>, scalar_prefetch = 0 : i64, scratch_operands = 0 : i64, tpu.core_type = #tpu.core_type<tc>, window_params = [{transform_indices = @transform_0, window_bounds = array<i64: 128, 16>}, {pipeline_mode = #tpu.pipeline_mode<synchronous>, transform_indices = @transform_1, window_bounds = array<i64: 16, 64>}, {pipeline_mode = #tpu.pipeline_mode<synchronous>, transform_indices = @transform_2, window_bounds = array<i64: 1, 64>}, {pipeline_mode = #tpu.pipeline_mode<synchronous>, transform_indices = @transform_3, window_bounds = array<i64: 64, 8>}, {transform_indices = @transform_4, window_bounds = array<i64: 128, 65>}, {transform_indices = @transform_5, window_bounds = array<i64: 128, 8>}]} {
    %c0 = arith.constant 0 : index
    %c0_0 = arith.constant 0 : index
    %0 = vector.load %arg1[%c0, %c0_0] : memref<128x16xbf16, #tpu.memory_space<vmem>>, vector<128x16xbf16>
    %c0_1 = arith.constant 0 : index
    %c0_2 = arith.constant 0 : index
    %1 = vector.load %arg2[%c0_1, %c0_2] : memref<16x64xbf16, #tpu.memory_space<vmem>>, vector<16x64xbf16>
    %cst = arith.constant dense<0.000000e+00> : vector<128x64xf32>
    %2 = tpu.matmul %0, %1, %cst {dimension_numbers = #tpu.dot_dimension_numbers<[1], [0], [0], [1], [0, 0, 1, 1], [], []>} : vector<128x16xbf16>, vector<16x64xbf16>, vector<128x64xf32> -> vector<128x64xf32>
    %c0_3 = arith.constant 0 : index
    %c0_4 = arith.constant 0 : index
    %3 = vector.load %arg3[%c0_3, %c0_4] : memref<1x64xf32, #tpu.memory_space<vmem>>, vector<1x64xf32>
    %4 = vector.broadcast %3 : vector<1x64xf32> to vector<128x64xf32>
    %5 = arith.addf %2, %4 : vector<128x64xf32>
    %c0_5 = arith.constant 0 : index
    %c0_6 = arith.constant 0 : index
    %6 = vector.load %arg4[%c0_5, %c0_6] : memref<64x8xf32, #tpu.memory_space<vmem>>, vector<64x8xf32>
    %cst_7 = arith.constant dense<0.000000e+00> : vector<128x8xf32>
    %7 = tpu.matmul %5, %6, %cst_7 {dimension_numbers = #tpu.dot_dimension_numbers<[1], [0], [0], [1], [0, 0, 1, 1], [], []>} : vector<128x64xf32>, vector<64x8xf32>, vector<128x8xf32> -> vector<128x8xf32>
    %c0_8 = arith.constant 0 : index
    %c0_9 = arith.constant 0 : index
    %8 = vector.load %arg6[%c0_8, %c0_9] : memref<128x8xf32, #tpu.memory_space<vmem>>, vector<128x8xf32>
    tpu.vector_store %arg6[%c0_8, %c0_9], %7 {strides = array<i32>} : memref<128x8xf32, #tpu.memory_space<vmem>>, vector<128x8xf32>,
    %9 = arith.truncf %5 : vector<128x64xf32> to vector<128x64xbf16>
    %c0_10 = arith.constant 0 : index
    %c0_11 = arith.constant 0 : index
    %10 = vector.load %arg5[%c0_10, %c0_11] : memref<128x65xbf16, #tpu.memory_space<vmem>>, vector<128x64xbf16>
    tpu.vector_store %arg5[%c0_10, %c0_11], %9 {strides = array<i32>} : memref<128x65xbf16, #tpu.memory_space<vmem>>, vector<128x64xbf16>,
    %cst_12 = arith.constant 1.000000e+00 : bf16
    %11 = vector.broadcast %cst_12 : bf16 to vector<128x1xbf16>
    %c0_13 = arith.constant 0 : index
    %c64 = arith.constant 64 : index
    %12 = vector.load %arg5[%c0_13, %c64] : memref<128x65xbf16, #tpu.memory_space<vmem>>, vector<128x1xbf16>
    tpu.vector_store %arg5[%c0_13, %c64], %11 {strides = array<i32>} : memref<128x65xbf16, #tpu.memory_space<vmem>>, vector<128x1xbf16>,
    return
  }
  func.func @transform_0(%arg0: i32) -> (i32, i32) {
    %c0_i32 = arith.constant 0 : i32
    %c0_i32_0 = arith.constant 0 : i32
    return %arg0, %c0_i32 : i32, i32
  }
  func.func @transform_1(%arg0: i32) -> (i32, i32) {
    %c0_i32 = arith.constant 0 : i32
    %c0_i32_0 = arith.constant 0 : i32
    %c0_i32_1 = arith.constant 0 : i32
    return %c0_i32, %c0_i32_0 : i32, i32
  }
  func.func @transform_2(%arg0: i32) -> (i32, i32) {
    %c0_i32 = arith.constant 0 : i32
    %c0_i32_0 = arith.constant 0 : i32
    %c0_i32_1 = arith.constant 0 : i32
    return %c0_i32, %c0_i32_0 : i32, i32
  }
  func.func @transform_3(%arg0: i32) -> (i32, i32) {
    %c0_i32 = arith.constant 0 : i32
    %c0_i32_0 = arith.constant 0 : i32
    %c0_i32_1 = arith.constant 0 : i32
    return %c0_i32, %c0_i32_0 : i32, i32
  }
  func.func @transform_4(%arg0: i32) -> (i32, i32) {
    %c0_i32 = arith.constant 0 : i32
    %c0_i32_0 = arith.constant 0 : i32
    return %arg0, %c0_i32 : i32, i32
  }
  func.func @transform_5(%arg0: i32) -> (i32, i32) {
    %c0_i32 = arith.constant 0 : i32
    %c0_i32_0 = arith.constant 0 : i32
    return %arg0, %c0_i32 : i32, i32
  }
}

</mosaic_0001>

<bundles_post_ra>
// kernel: tpu_custom_call.1
= control target key start
LH: loop header
LB: loop body
LE: loop exit
PB: predicated region body
PF: predicated region fallthrough
CT: control target
= control target key end

     0   :  { %vm92_vm0 = vcmask 130048   ;;  %vm222_vm1 = vcmask 523264   ;;  %vm497_vm2 = vcmask 519168   ;;  %vm514_vm3 = vcmask 527872   ;;  %s1065_s1 = inlined_call_operand.vmem [shape: bf16[16,64], index: 1, kind: input, shape index: {}]   ;;  %s1066_s0 = inlined_call_operand.vmem [shape: bf16[128,16], index: 0, kind: input, shape index: {}]   ;;  %s1067_s3 = inlined_call_operand.vmem [shape: f32[64,8], index: 3, kind: input, shape index: {}]   ;;  %s1068_s2 = inlined_call_operand.vmem [shape: f32[1,64], index: 2, kind: input, shape index: {}]   ;;  %s1069_s4 = inlined_call_operand.vmem [shape: bf16[128,65], index: 4, kind: output, shape index: {0}]   ;;  %s1070_s5 = inlined_call_operand.vmem [shape: f32[128,8], index: 5, kind: output, shape index: {1}]  }
   0x1   :  { %v721_v0 = vld [vmem:[%s1065_s1] sm:$0xff]   ;;  %v723_v2 = vld [vmem:[%s1066_s0 + $0x8] sm:$0xff]   ;;  %v724_v3 = vld [vmem:[%s1066_s0 + $0x10] sm:$0xff]   ;;  %v730_v33 = vmov 1065369472   ;;  %vm416_vm4 = vcmask 64512  }
   0x2   :  { %v722_v1 = vld [vmem:[%s1066_s0] sm:$0xff]   ;;  %638 = vmatprep.subr.bf16.mxu0 %v721_v0  ;;  %v215_v5 = vld [vmem:[%s1067_s3 + $0x8] sm:$0xff]  ;;  %v216_v6 = vld [vmem:[%s1067_s3 + $0x10] sm:$0xff] }
   0x3   :  { %639 = vmatpush3.bf16.msra.mxu0 %v721_v0  ;;  %640 = vmatprep.mubr.msk.bf16.mxu0 %vm92_vm0, %v722_v1  ;;  %v214_v4 = vld [vmem:[%s1067_s3] sm:$0xff]  ;;  %v725_v7 = vld [vmem:[%s1066_s0 + $0x18] sm:$0xff]   ;;  %v219_v13 = vld [vmem:[%s1067_s3 + $0x28] sm:$0xff] }
   0x4   :  { %v696_v8 = vpack.c.bf16 %v215_v5, %v214_v4  ;;  %v217_v9 = vld [vmem:[%s1067_s3 + $0x18] sm:$0xff]  ;;  %v726_v10 = vld [vmem:[%s1066_s0 + $0x20] sm:$0xff]   ;;  %v727_v15 = vld [vmem:[%s1066_s0 + $0x28] sm:$0xff]  }
   0x5   :  { %v700_v11 = vpack.c.bf16 %v217_v9, %v216_v6  ;;  %v218_v12 = vld [vmem:[%s1067_s3 + $0x20] sm:$0xff]  ;;  %v728_v16 = vld [vmem:[%s1066_s0 + $0x30] sm:$0xff]   ;;  %v729_v17 = vld [vmem:[%s1066_s0 + $0x38] sm:$0xff]  }
   0x6   :  { %641 = vmatmul.mubr.msk.bf16.vlgmr.msra.gmra.mrb[0].mxu0 %vm92_vm0, %v723_v2  ;;  %712 = vmatprep.subr.bf16.mxu1 %v696_v8  ;;  %v704_v14 = vpack.c.bf16 %v219_v13, %v218_v12  ;;  %v220_v18 = vld [vmem:[%s1067_s3 + $0x30] sm:$0xff]  ;;  %v221_v19 = vld [vmem:[%s1067_s3 + $0x38] sm:$0xff]  ;;  %v823_v21 = vld [vmem:[%s1068_s2] ss:$0 sm:$0xff] }
   0x7   :  { %644 = vmatprep.mubr.msk.bf16.mxu0 %vm92_vm0, %v724_v3  ;;  %697 = vmatprep.subr.bf16.mxu0 %v696_v8  ;;  %v708_v20 = vpack.c.bf16 %v221_v19, %v220_v18 }
   0x8   :  { %716 = vmatpush3.bf16.msra.mxu1 %v696_v8  ;;  %699 = vmatpush3.bf16.msra.mxu0 %v696_v8 }
   0x9   :  { %713 = vmatprep.subr.bf16.mxu1 %v700_v11  ;;  %701 = vmatprep.subr.bf16.mxu0 %v700_v11 }
   0xc   :  { %717 = vmatpush3.bf16.msra.mxu1 %v700_v11  ;;  %703 = vmatpush3.bf16.msra.mxu0 %v700_v11 }
   0xd   :  { %714 = vmatprep.subr.bf16.mxu1 %v704_v14  ;;  %705 = vmatprep.subr.bf16.mxu0 %v704_v14 }
   0xe   :  { %645 = vmatmul.mubr.msk.bf16.gmra.mrb[4].mxu0 %vm92_vm0, %v725_v7 }
   0xf   :  { %648 = vmatprep.mubr.msk.bf16.mxu0 %vm92_vm0, %v726_v10 }
  0x10   :  { %718 = vmatpush3.bf16.msra.mxu1 %v704_v14  ;;  %707 = vmatpush3.bf16.msra.mxu0 %v704_v14 }
  0x11   :  { %715 = vmatprep.subr.bf16.mxu1 %v708_v20  ;;  %709 = vmatprep.subr.bf16.mxu0 %v708_v20 }
  0x14   :  { %719 = vmatpush3.bf16.msra.mxu1 %v708_v20  ;;  %711 = vmatpush3.bf16.msra.mxu0 %v708_v20 }
  0x16   :  { %649 = vmatmul.mubr.msk.bf16.gmra.mrb[8].mxu0 %vm92_vm0, %v727_v15 }
  0x17   :  { %652 = vmatprep.mubr.msk.bf16.mxu0 %vm92_vm0, %v728_v16 }
  0x1e   :  { %653 = vmatmul.mubr.msk.bf16.gmra.mrb[12].mxu0 %vm92_vm0, %v729_v17 }
  0xd9   :  { %v642_v22 = vpop.f32.mrb[0].mxu0 }
  0xda   :  { %v160_v23 = vadd.f32 %v642_v22, %v823_v21  ;;  %v151_v24 = vpop.f32.mrb[1].mxu0 }
  0xdb   :  { %v152_v25 = vadd.f32 %v823_v21, %v151_v24  ;;  %v643_v26 = vpop.f32.mrb[2].mxu0 }
  0xdc   :  { %v591_v27 = vpack.c.bf16 %v160_v23, %v160_v23  ;;  %v163_v28 = vadd.f32 %v643_v26, %v823_v21  ;;  %v154_v29 = vpop.f32.mrb[3].mxu0  ;;  %675 = vmatprep.mubr.msk.f32.mxu1 %vm222_vm1, %v160_v23 }
  0xdd   :  { %v589_v30 = vpack.c.bf16 %v152_v25, %v152_v25  ;;  %v155_v31 = vadd.f32 %v823_v21, %v154_v29  ;;  %672 = vmatprep.mubr.msk.f32.mxu0 %vm222_vm1, %v152_v25 }
  0xde   :  { %500 = vst.msk [vmem:[%s1069_s4 + $0x8] sm:$0xf] %vm497_vm2, %v591_v27  ;;  %v592_v32 = vpack.c.bf16 %v163_v28, %v163_v28  ;;  %676 = vmatmul.mubr.msk.f32.vlgmr.msra.gmra.mrb[0].mxu1 %vm222_vm1, %v163_v28 }
  0xdf   :  { %517 = vst.msk [vmem:[%s1069_s4 + $0x8] sm:$0xf] %vm514_vm3, %v730_v33  ;;  %v590_v34 = vpack.c.bf16 %v155_v31, %v155_v31  ;;  %673 = vmatmul.mubr.msk.f32.vlgmr.msra.gmra.mrb[16].mxu0 %vm222_vm1, %v155_v31 }
  0xe0   :  { %498 = vst.msk [vmem:[%s1069_s4] sm:$0xf] %vm497_vm2, %v589_v30  ;;  %501 = vst.msk [vmem:[%s1069_s4 + $0xc] sm:$0xf] %vm497_vm2, %v592_v32 }
  0xe1   :  { %515 = vst.msk [vmem:[%s1069_s4] sm:$0xf] %vm514_vm3, %v730_v33  ;;  %518 = vst.msk [vmem:[%s1069_s4 + $0xc] sm:$0xf] %vm514_vm3, %v730_v33  ;;  %v646_v35 = vpop.f32.mrb[4].mxu0 }
  0xe2   :  { %499 = vst.msk [vmem:[%s1069_s4 + $0x4] sm:$0xf] %vm497_vm2, %v590_v34  ;;  %v176_v36 = vadd.f32 %v646_v35, %v823_v21  ;;  %v167_v37 = vpop.f32.mrb[5].mxu0 }
  0xe3   :  { %516 = vst.msk [vmem:[%s1069_s4 + $0x4] sm:$0xf] %vm514_vm3, %v730_v33  ;;  %v168_v38 = vadd.f32 %v823_v21, %v167_v37  ;;  %v647_v39 = vpop.f32.mrb[6].mxu0 }
  0xe4   :  { %v595_v40 = vpack.c.bf16 %v176_v36, %v176_v36  ;;  %v179_v41 = vadd.f32 %v647_v39, %v823_v21  ;;  %v170_v42 = vpop.f32.mrb[7].mxu0 }
  0xe5   :  { %v593_v43 = vpack.c.bf16 %v168_v38, %v168_v38  ;;  %v171_v44 = vadd.f32 %v823_v21, %v170_v42  ;;  %678 = vmatprep.mubr.msk.f32.mxu1 %vm222_vm1, %v168_v38 }
  0xe6   :  { %504 = vst.msk [vmem:[%s1069_s4 + $0x18] sm:$0xf] %vm497_vm2, %v595_v40  ;;  %v596_v45 = vpack.c.bf16 %v179_v41, %v179_v41 }
  0xe7   :  { %521 = vst.msk [vmem:[%s1069_s4 + $0x18] sm:$0xf] %vm514_vm3, %v730_v33  ;;  %v594_v46 = vpack.c.bf16 %v171_v44, %v171_v44  ;;  %679 = vmatmul.mubr.msk.f32.gmra.mrb[2].mxu1 %vm222_vm1, %v171_v44 }
  0xe8   :  { %502 = vst.msk [vmem:[%s1069_s4 + $0x10] sm:$0xf] %vm497_vm2, %v593_v43  ;;  %505 = vst.msk [vmem:[%s1069_s4 + $0x1c] sm:$0xf] %vm497_vm2, %v596_v45  ;;  %681 = vmatprep.mubr.msk.f32.mxu1 %vm222_vm1, %v176_v36 }
  0xe9   :  { %519 = vst.msk [vmem:[%s1069_s4 + $0x10] sm:$0xf] %vm514_vm3, %v730_v33  ;;  %522 = vst.msk [vmem:[%s1069_s4 + $0x1c] sm:$0xf] %vm514_vm3, %v730_v33  ;;  %v650_v47 = vpop.f32.mrb[8].mxu0 }
  0xea   :  { %503 = vst.msk [vmem:[%s1069_s4 + $0x14] sm:$0xf] %vm497_vm2, %v594_v46  ;;  %v192_v48 = vadd.f32 %v650_v47, %v823_v21  ;;  %v183_v49 = vpop.f32.mrb[9].mxu0 }
  0xeb   :  { %520 = vst.msk [vmem:[%s1069_s4 + $0x14] sm:$0xf] %vm514_vm3, %v730_v33  ;;  %v184_v50 = vadd.f32 %v823_v21, %v183_v49  ;;  %v651_v51 = vpop.f32.mrb[10].mxu0  ;;  %682 = vmatmul.mubr.msk.f32.gmra.mrb[4].mxu1 %vm222_vm1, %v179_v41 }
  0xec   :  { %v599_v52 = vpack.c.bf16 %v192_v48, %v192_v48  ;;  %v195_v53 = vadd.f32 %v651_v51, %v823_v21  ;;  %v186_v54 = vpop.f32.mrb[11].mxu0 }
  0xed   :  { %v597_v55 = vpack.c.bf16 %v184_v50, %v184_v50  ;;  %v187_v56 = vadd.f32 %v823_v21, %v186_v54  ;;  %684 = vmatprep.mubr.msk.f32.mxu1 %vm222_vm1, %v184_v50 }
  0xee   :  { %508 = vst.msk [vmem:[%s1069_s4 + $0x28] sm:$0xf] %vm497_vm2, %v599_v52  ;;  %v600_v57 = vpack.c.bf16 %v195_v53, %v195_v53 }
  0xef   :  { %525 = vst.msk [vmem:[%s1069_s4 + $0x28] sm:$0xf] %vm514_vm3, %v730_v33  ;;  %v598_v58 = vpack.c.bf16 %v187_v56, %v187_v56  ;;  %685 = vmatmul.mubr.msk.f32.gmra.mrb[6].mxu1 %vm222_vm1, %v187_v56 }
  0xf0   :  { %506 = vst.msk [vmem:[%s1069_s4 + $0x20] sm:$0xf] %vm497_vm2, %v597_v55  ;;  %509 = vst.msk [vmem:[%s1069_s4 + $0x2c] sm:$0xf] %vm497_vm2, %v600_v57  ;;  %687 = vmatprep.mubr.msk.f32.mxu1 %vm222_vm1, %v192_v48 }
  0xf1   :  { %523 = vst.msk [vmem:[%s1069_s4 + $0x20] sm:$0xf] %vm514_vm3, %v730_v33  ;;  %526 = vst.msk [vmem:[%s1069_s4 + $0x2c] sm:$0xf] %vm514_vm3, %v730_v33  ;;  %v654_v59 = vpop.f32.mrb[12].mxu0 }
  0xf2   :  { %507 = vst.msk [vmem:[%s1069_s4 + $0x24] sm:$0xf] %vm497_vm2, %v598_v58  ;;  %v208_v60 = vadd.f32 %v654_v59, %v823_v21  ;;  %v199_v61 = vpop.f32.mrb[13].mxu0 }
  0xf3   :  { %524 = vst.msk [vmem:[%s1069_s4 + $0x24] sm:$0xf] %vm514_vm3, %v730_v33  ;;  %v200_v62 = vadd.f32 %v823_v21, %v199_v61  ;;  %v655_v63 = vpop.f32.mrb[14].mxu0  ;;  %688 = vmatmul.mubr.msk.f32.gmra.mrb[8].mxu1 %vm222_vm1, %v195_v53 }
  0xf4   :  { %v603_v0 = vpack.c.bf16 %v208_v60, %v208_v60  ;;  %v211_v1 = vadd.f32 %v655_v63, %v823_v21  ;;  %v202_v2 = vpop.f32.mrb[15].mxu0 }
  0xf5   :  { %v601_v3 = vpack.c.bf16 %v200_v62, %v200_v62  ;;  %v203_v4 = vadd.f32 %v823_v21, %v202_v2  ;;  %690 = vmatprep.mubr.msk.f32.mxu1 %vm222_vm1, %v200_v62 }
  0xf6   :  { %512 = vst.msk [vmem:[%s1069_s4 + $0x38] sm:$0xf] %vm497_vm2, %v603_v0  ;;  %v604_v5 = vpack.c.bf16 %v211_v1, %v211_v1 }
  0xf7   :  { %529 = vst.msk [vmem:[%s1069_s4 + $0x38] sm:$0xf] %vm514_vm3, %v730_v33  ;;  %v602_v6 = vpack.c.bf16 %v203_v4, %v203_v4  ;;  %691 = vmatmul.mubr.msk.f32.gmra.mrb[10].mxu1 %vm222_vm1, %v203_v4 }
  0xf8   :  { %510 = vst.msk [vmem:[%s1069_s4 + $0x30] sm:$0xf] %vm497_vm2, %v601_v3  ;;  %513 = vst.msk [vmem:[%s1069_s4 + $0x3c] sm:$0xf] %vm497_vm2, %v604_v5  ;;  %693 = vmatprep.mubr.msk.f32.mxu1 %vm222_vm1, %v208_v60 }
  0xf9   :  { %527 = vst.msk [vmem:[%s1069_s4 + $0x30] sm:$0xf] %vm514_vm3, %v730_v33  ;;  %530 = vst.msk [vmem:[%s1069_s4 + $0x3c] sm:$0xf] %vm514_vm3, %v730_v33 }
  0xfa   :  { %511 = vst.msk [vmem:[%s1069_s4 + $0x34] sm:$0xf] %vm497_vm2, %v602_v6 }
  0xfb   :  { %528 = vst.msk [vmem:[%s1069_s4 + $0x34] sm:$0xf] %vm514_vm3, %v730_v33  ;;  %694 = vmatmul.mubr.msk.f32.gmra.mrb[12].mxu1 %vm222_vm1, %v211_v1 }
 0x1b1   :  { %v677_v7 = vpop.f32.mrb[0].mxu1 }
 0x1b2   :  { %420 = vst.msk [vmem:[%s1070_s5 + $0x18] sm:$0xff] %vm416_vm4, %v677_v7  ;;  %v674_v8 = vpop.f32.mrb[16].mxu0  ;;  %v347_v9 = vpop.f32.mrb[1].mxu1 }
 0x1b3   :  { %418 = vst.msk [vmem:[%s1070_s5 + $0x8] sm:$0xff] %vm416_vm4, %v674_v8  ;;  %419 = vst.msk [vmem:[%s1070_s5 + $0x10] sm:$0xff] %vm416_vm4, %v347_v9  ;;  %v337_v10 = vpop.f32.mrb[17].mxu0 }
 0x1b4   :  { %417 = vst.msk [vmem:[%s1070_s5] sm:$0xff] %vm416_vm4, %v337_v10 }
 0x1ba   :  { %v680_v11 = vpop.f32.mrb[2].mxu1 }
 0x1bb   :  { %422 = vst.msk [vmem:[%s1070_s5 + $0x28] sm:$0xff] %vm416_vm4, %v680_v11  ;;  %v357_v12 = vpop.f32.mrb[3].mxu1 }
 0x1bc   :  { %421 = vst.msk [vmem:[%s1070_s5 + $0x20] sm:$0xff] %vm416_vm4, %v357_v12 }
 0x1be   :  { %v683_v13 = vpop.f32.mrb[4].mxu1 }
 0x1bf   :  { %424 = vst.msk [vmem:[%s1070_s5 + $0x38] sm:$0xff] %vm416_vm4, %v683_v13  ;;  %v367_v14 = vpop.f32.mrb[5].mxu1 }
 0x1c0   :  { %423 = vst.msk [vmem:[%s1070_s5 + $0x30] sm:$0xff] %vm416_vm4, %v367_v14 }
 0x1c2   :  { %v686_v15 = vpop.f32.mrb[6].mxu1 }
 0x1c3   :  { %426 = vst.msk [vmem:[%s1070_s5 + $0x48] sm:$0xff] %vm416_vm4, %v686_v15  ;;  %v377_v16 = vpop.f32.mrb[7].mxu1 }
 0x1c4   :  { %425 = vst.msk [vmem:[%s1070_s5 + $0x40] sm:$0xff] %vm416_vm4, %v377_v16 }
 0x1c6   :  { %v689_v17 = vpop.f32.mrb[8].mxu1 }
 0x1c7   :  { %428 = vst.msk [vmem:[%s1070_s5 + $0x58] sm:$0xff] %vm416_vm4, %v689_v17  ;;  %v387_v18 = vpop.f32.mrb[9].mxu1 }
 0x1c8   :  { %427 = vst.msk [vmem:[%s1070_s5 + $0x50] sm:$0xff] %vm416_vm4, %v387_v18 }
 0x1ca   :  { %v692_v19 = vpop.f32.mrb[10].mxu1 }
 0x1cb   :  { %430 = vst.msk [vmem:[%s1070_s5 + $0x68] sm:$0xff] %vm416_vm4, %v692_v19  ;;  %v397_v20 = vpop.f32.mrb[11].mxu1 }
 0x1cc   :  { %429 = vst.msk [vmem:[%s1070_s5 + $0x60] sm:$0xff] %vm416_vm4, %v397_v20 }
 0x1ce   :  { %v695_v21 = vpop.f32.mrb[12].mxu1 }
 0x1cf   :  { %432 = vst.msk [vmem:[%s1070_s5 + $0x78] sm:$0xff] %vm416_vm4, %v695_v21  ;;  %v407_v22 = vpop.f32.mrb[13].mxu1 }
 0x1d0   :  { %431 = vst.msk [vmem:[%s1070_s5 + $0x70] sm:$0xff] %vm416_vm4, %v407_v22 }

</bundles_post_ra>
